<compile_context>
chip_gen: v7x
topology: tpu7x:2x2x1
jax: 0.10.0
libtpu: 0.0.40
codegen_flags: <defaults>
</compile_context>

<pallas_src>
import jax
import jax.numpy as jnp
from jax.experimental import pallas as pl
from jax.experimental.pallas import tpu as pltpu

# TODO(synk): backward-pass randomization (grad at exact zeros replaced by
# uniform noise) is autograd-only behavior and not part of the forward kernel.

_TARGET_BLOCK_BYTES = 2 * 1024 * 1024          # ~2 MiB per block
_WIDTH_CANDIDATES = (8192, 4096, 2048, 1024, 512, 256, 128)


def _relu_kernel(x_ref, o_ref):
    # Weak-typed 0 preserves the input dtype (no promotion for int inputs).
    o_ref[...] = jnp.maximum(x_ref[...], 0)


def relu_random_forward(x):
    """Elementwise ReLU via a Pallas TPU kernel. x: any shape (NCHW expected)."""
    orig_shape = x.shape
    n_elem = x.size
    if n_elem == 0:
        return x

    itemsize = jnp.dtype(x.dtype).itemsize
    # Native sublane packing: 8 rows for 4-byte, 16 for 2-byte, 32 for 1-byte.
    pack = max(8, (4 // itemsize) * 8)

    # Pick the widest lane-dense slab width that divides the element count
    # so no pad/slice is needed; fall back to a padded 128-wide slab only
    # when nothing divides.
    width = None
    for w in _WIDTH_CANDIDATES:
        if n_elem % w == 0:
            width = w
            break

    x_flat = x.reshape(-1)
    if width is None:
        width = 128
        rows = pl.cdiv(n_elem, width)
        padded = rows * width
        x_flat = jnp.pad(x_flat, (0, padded - n_elem))
    else:
        rows = n_elem // width

    x2d = x_flat.reshape(rows, width)

    # ~2 MiB blocks on a dtype-aware sublane multiple; use the full row
    # extent when the array is small (full-dim blocks are always legal).
    block_rows = (_TARGET_BLOCK_BYTES // (width * itemsize)) // pack * pack
    block_rows = max(pack, block_rows)
    if block_rows >= rows:
        block_rows = rows

    grid = (pl.cdiv(rows, block_rows),)

    out2d = pl.pallas_call(
        _relu_kernel,
        out_shape=jax.ShapeDtypeStruct((rows, width), x.dtype),
        grid_spec=pltpu.PrefetchScalarGridSpec(
            num_scalar_prefetch=0,
            grid=grid,
            in_specs=[pl.BlockSpec((block_rows, width), lambda i: (i, 0))],
            out_specs=pl.BlockSpec((block_rows, width), lambda i: (i, 0)),
        ),
        compiler_params=pltpu.CompilerParams(
            dimension_semantics=("parallel",)
        ),
    )(x2d)

    out_flat = out2d.reshape(-1)
    if out_flat.shape[0] != n_elem:          # only in the (rare) padded path
        out_flat = out_flat[:n_elem]
    return out_flat.reshape(orig_shape)


if __name__ == "__main__":
    key = jax.random.PRNGKey(0)

    # Primary test: small NCHW input consistent with typical module usage.
    x = jax.random.normal(key, (2, 4, 16, 16), dtype=jnp.float32)
    out = jax.block_until_ready(relu_random_forward(x))
    ref = jnp.maximum(x, 0.0)
    assert out.shape == x.shape and out.dtype == x.dtype
    assert jnp.allclose(out, ref), "Pallas ReLU mismatch vs reference (f32 NCHW)"

    # Secondary checks: awkward size (padded fallback path) and bf16 packing.
    x_odd = jax.random.normal(jax.random.PRNGKey(1), (3, 5, 7, 11), jnp.float32)
    out_odd = jax.block_until_ready(relu_random_forward(x_odd))
    assert jnp.allclose(out_odd, jnp.maximum(x_odd, 0.0)), "mismatch (odd shape)"

    x_bf16 = jax.random.normal(jax.random.PRNGKey(2), (2, 4, 16, 16)).astype(jnp.bfloat16)
    out_bf16 = jax.block_until_ready(relu_random_forward(x_bf16))
    assert out_bf16.dtype == jnp.bfloat16
    assert jnp.allclose(out_bf16, jnp.maximum(x_bf16, 0)), "mismatch (bf16)"

    print("KERNEL_OK")
</pallas_src>

<mosaic_0001>
module attributes {stable_mosaic.version = 11 : i64} {
  func.func @_relu_kernel(%arg0: i32, %arg1: memref<1x2048xf32, #tpu.memory_space<vmem>>, %arg2: memref<1x2048xf32, #tpu.memory_space<vmem>>) attributes {dimension_semantics = [#tpu.dimension_semantics<parallel>], iteration_bounds = array<i64: 1>, scalar_prefetch = 0 : i64, scratch_operands = 0 : i64, tpu.core_type = #tpu.core_type<tc>, window_params = [{transform_indices = @transform_0, window_bounds = array<i64: 1, 2048>}, {transform_indices = @transform_1, window_bounds = array<i64: 1, 2048>}]} {
    %c0 = arith.constant 0 : index
    %c0_0 = arith.constant 0 : index
    %0 = vector.load %arg1[%c0, %c0_0] : memref<1x2048xf32, #tpu.memory_space<vmem>>, vector<1x2048xf32>
    %cst = arith.constant 0.000000e+00 : f32
    %1 = vector.broadcast %cst : f32 to vector<1x2048xf32>
    %2 = arith.maximumf %0, %1 : vector<1x2048xf32>
    %c0_1 = arith.constant 0 : index
    %c0_2 = arith.constant 0 : index
    %3 = vector.load %arg2[%c0_1, %c0_2] : memref<1x2048xf32, #tpu.memory_space<vmem>>, vector<1x2048xf32>
    tpu.vector_store %arg2[%c0_1, %c0_2], %2 {strides = array<i32>} : memref<1x2048xf32, #tpu.memory_space<vmem>>, vector<1x2048xf32>,
    return
  }
  func.func @transform_0(%arg0: i32) -> (i32, i32) {
    %c0_i32 = arith.constant 0 : i32
    %c0_i32_0 = arith.constant 0 : i32
    return %arg0, %c0_i32 : i32, i32
  }
  func.func @transform_1(%arg0: i32) -> (i32, i32) {
    %c0_i32 = arith.constant 0 : i32
    %c0_i32_0 = arith.constant 0 : i32
    return %arg0, %c0_i32 : i32, i32
  }
}

</mosaic_0001>

<bundles_post_ra>
// kernel: tpu_custom_call.1
= control target key start
LH: loop header
LB: loop body
LE: loop exit
PB: predicated region body
PF: predicated region fallthrough
CT: control target
= control target key end

     0   :  { %6 = vsyncpa [#allocation3], 0  ;;  %s128_s0 = inlined_call_operand.hbm [shape: f32[1,2048], index: 0, kind: input, shape index: {}]   ;;  %s129_s1 = inlined_call_operand.hbm [shape: f32[1,2048], index: 1, kind: output, shape index: {}]  }
   0x1   :  { %7 = vsyncpa [#allocation4], 0  ;;  %s92_s6 = smov [#allocation2]   ;;  %s44_s10 = scalar_lea.hbm %s128_s0, 256 }
   0x2   :  { %s14_s7 = sshll.u32 %s92_s6, 4  ;;  %p45_p0 = scmp.ne.s32.totalorder %s128_s0, %s44_s10  ;;  %s15_s7 = int_to_ptr.vmem [resolvable:$true] %s14_s7 }
   0x3   :  { %p48_p1 = scmp.lt.u32.totalorder %s44_s10, %s128_s0 }
   0x5   :  { %p50_p2 = pnand %p48_p1, %p45_p0 }
   0x7   :  { %53 = shalt.err (!%p50_p2)
}
   0x8   :  { %s54_s15 = scalar_lea.vmem %s15_s7, 256  ;;  %p59_p4 = scmp.lt.s32.totalorder %s15_s7, %s15_s7 }
   0x9   :  { %p55_p3 = scmp.ne.s32.totalorder %s15_s7, %s54_s15  ;;  %p60_p5 = scmp.lt.s32.totalorder %s54_s15, %s54_s15 }
   0xb   :  { %p61_p6 = por %p60_p5, %p59_p4 }
   0xd   :  { %p62_p7 = pnand %p61_p6, %p55_p3 }
   0xf   :  { %65 = shalt.err (!%p62_p7)
}
  0x10   :  { %17 = dma.hbm_to_vmem [thread:$0]  %s128_s0, 256, %s15_s7, [#allocation3]  }
  0x11   :  { %88 = dma.done.wait [#allocation3], 256  }
  0x12   :  { %89 = vsyncadd [#allocation3], 4294967040  ;;  %s93_s18 = smov [#allocation5]   ;;  %v21_v0 = vld [vmem:[#allocation2] sm:$0xff]  ;;  %v22_v1 = vld [vmem:[#allocation2 + $0x8] sm:$0xff] }
  0x13   :  { %s33_s19 = sshll.u32 %s93_s18, 4  ;;  %v23_v2 = vmax.f32 %v21_v0, 0.0  ;;  %v24_v3 = vmax.f32 %v22_v1, 0.0  ;;  %s34_s19 = int_to_ptr.vmem [resolvable:$true] %s33_s19 }
  0x14   :  { %s66_s20 = scalar_lea.vmem %s34_s19, 256  ;;  %p71_p9 = scmp.lt.s32.totalorder %s34_s19, %s34_s19 }
  0x15   :  { %25 = vst [vmem:[#allocation5] sm:$0xff] %v23_v2  ;;  %26 = vst [vmem:[#allocation5 + $0x8] sm:$0xff] %v24_v3  ;;  %p67_p8 = scmp.ne.s32.totalorder %s34_s19, %s66_s20  ;;  %p72_p10 = scmp.lt.s32.totalorder %s66_s20, %s66_s20 }
  0x17   :  { %p73_p11 = por %p72_p10, %p71_p9 }
  0x19   :  { %p74_p12 = pnand %p73_p11, %p67_p8 }
  0x1b   :  { %77 = shalt.err (!%p74_p12)
}
  0x1c   :  { %s78_s22 = scalar_lea.hbm %s129_s1, 256 }
  0x1d   :  { %p79_p13 = scmp.ne.s32.totalorder %s129_s1, %s78_s22  ;;  %p82_p0 = scmp.lt.u32.totalorder %s78_s22, %s129_s1 }
  0x1f   :  { %p84_p1 = pnand %p82_p0, %p79_p13 }
  0x21   :  { %87 = shalt.err (!%p84_p1)
}
  0x22   :  { %36 = dma.vmem_to_hbm [thread:$0]  %s34_s19, 256, %s129_s1, [#allocation4]  }
  0x23   :  { %90 = dma.done.wait [#allocation4], 256  }
  0x24   :  { %91 = vsyncadd [#allocation4], 4294967040 }
  0x25   :  { %40 = vsyncpa [#allocation3], 1 }
  0x26   :  { %41 = vsyncpa [#allocation4], 1 }

</bundles_post_ra>
